<compile_context>
chip_gen: v5e
topology: v5e:2x2
jax: 0.10.0
libtpu: 0.0.40
codegen_flags: <defaults>
</compile_context>

<pallas_src>
import functools

import jax
import jax.numpy as jnp
from jax import lax
from jax.experimental import pallas as pl
from jax.experimental.pallas import tpu as pltpu


def _round_up(x, m):
    return (x + m - 1) // m * m


def _choose_tile_k(k128, m_pad, itemsize, budget_bytes=8 << 20):
    """Largest lane tile (multiple of 128, <= k128) whose double-buffered
    input slab 2 * m_pad * tile * itemsize stays within budget."""
    tile = 128
    for cand in (256, 512, 1024, 2048, 4096):
        if cand > k128:
            break
        if 2 * m_pad * cand * itemsize <= budget_bytes:
            tile = cand
    return tile


def _flatten_pad(feature):
    """NCHW -> zero-padded (M_pad, K_pad) slab + geometry."""
    b, c, h, w = feature.shape
    m, kdim = b * c, h * w
    f2 = feature.reshape(m, kdim)
    m_pad = _round_up(m, 8)
    k128 = _round_up(kdim, 128)
    tile_k = _choose_tile_k(k128, m_pad, feature.dtype.itemsize)
    k_pad = _round_up(kdim, tile_k)
    if (m_pad, k_pad) != (m, kdim):
        f2 = jnp.pad(f2, ((0, m_pad - m), (0, k_pad - kdim)))
    return f2, m, kdim, m_pad, k_pad, tile_k


# ----------------------------------------------------------------------------
# Kernels
# ----------------------------------------------------------------------------
def _gram_kernel(x_ref, g_ref, acc_ref, *, inv_n):
    """Accumulate F_tile @ F_tile.T over the K grid; write G/N on last step."""
    k = pl.program_id(0)

    @pl.when(k == 0)
    def _():
        acc_ref[...] = jnp.zeros_like(acc_ref)

    f = x_ref[...].astype(jnp.float32)
    acc_ref[...] += lax.dot_general(
        f, f, (((1,), (1,)), ((), ())), preferred_element_type=jnp.float32
    )

    @pl.when(k == pl.num_programs(0) - 1)
    def _():
        g_ref[...] = acc_ref[...] * jnp.float32(inv_n)


def _style_loss_kernel(x_ref, gt_ref, loss_ref, acc_ref, *, inv_n, inv_mm):
    """Fused gram_matrix(x) + MSE against the (padded) target Gram."""
    k = pl.program_id(0)

    @pl.when(k == 0)
    def _():
        acc_ref[...] = jnp.zeros_like(acc_ref)

    f = x_ref[...].astype(jnp.float32)
    acc_ref[...] += lax.dot_general(
        f, f, (((1,), (1,)), ((), ())), preferred_element_type=jnp.float32
    )

    @pl.when(k == pl.num_programs(0) - 1)
    def _():
        g = acc_ref[...] * jnp.float32(inv_n)
        d = g - gt_ref[...].astype(jnp.float32)
        # Padded rows/cols are zero in both g and gt -> contribute 0.
        loss_ref[0, 0] = jnp.sum(d * d) * jnp.float32(inv_mm)


# ----------------------------------------------------------------------------
# Wrappers
# ----------------------------------------------------------------------------
def gram_matrix(feature):
    """G = F @ F.T / (B*C*H*W) with F = feature.reshape(B*C, H*W)."""
    f2, m, kdim, m_pad, k_pad, tile_k = _flatten_pad(feature)
    n_total = m * kdim
    grid = (k_pad // tile_k,)

    g_pad = pl.pallas_call(
        functools.partial(_gram_kernel, inv_n=1.0 / n_total),
        out_shape=jax.ShapeDtypeStruct((m_pad, m_pad), jnp.float32),
        grid_spec=pltpu.PrefetchScalarGridSpec(
            num_scalar_prefetch=0,
            grid=grid,
            in_specs=[pl.BlockSpec((m_pad, tile_k), lambda k: (0, k))],
            out_specs=pl.BlockSpec((m_pad, m_pad), lambda k: (0, 0)),
            scratch_shapes=[pltpu.VMEM((m_pad, m_pad), jnp.float32)],
        ),
        compiler_params=pltpu.CompilerParams(
            dimension_semantics=("arbitrary",),
            vmem_limit_bytes=32 << 20,
        ),
    )(f2)
    return g_pad[:m, :m]


def style_loss(x, target_gram):
    """Returns (x, loss) with loss = mean((gram_matrix(x) - target_gram)**2).

    Matches StyleLoss.forward: output is the input passthrough; loss is the
    MSE between the input's Gram matrix and the precomputed target Gram."""
    f2, m, kdim, m_pad, k_pad, tile_k = _flatten_pad(x)
    assert target_gram.shape == (m, m), "target Gram / input channel mismatch"

    gt = target_gram.astype(jnp.float32)
    if m_pad != m:
        gt = jnp.pad(gt, ((0, m_pad - m), (0, m_pad - m)))

    n_total = m * kdim
    grid = (k_pad // tile_k,)

    loss = pl.pallas_call(
        functools.partial(
            _style_loss_kernel, inv_n=1.0 / n_total, inv_mm=1.0 / (m * m)
        ),
        out_shape=jax.ShapeDtypeStruct((1, 1), jnp.float32),
        grid_spec=pltpu.PrefetchScalarGridSpec(
            num_scalar_prefetch=0,
            grid=grid,
            in_specs=[
                pl.BlockSpec((m_pad, tile_k), lambda k: (0, k)),
                pl.BlockSpec((m_pad, m_pad), lambda k: (0, 0)),
            ],
            out_specs=pl.BlockSpec(
                (1, 1), lambda k: (0, 0), memory_space=pltpu.SMEM
            ),
            scratch_shapes=[pltpu.VMEM((m_pad, m_pad), jnp.float32)],
        ),
        compiler_params=pltpu.CompilerParams(
            dimension_semantics=("arbitrary",),
            vmem_limit_bytes=32 << 20,
        ),
    )(f2, gt)

    return x, loss[0, 0]


class StyleLoss:
    """Mirror of the PyTorch module: precompute target Gram, forward returns
    the input unchanged and stashes self.loss."""

    def __init__(self, target_feature):
        self.target = gram_matrix(target_feature)  # "detached" by construction
        self.loss = None

    def __call__(self, x):
        out, self.loss = style_loss(x, self.target)
        return out


if __name__ == "__main__":
    key = jax.random.PRNGKey(0)
    k1, k2 = jax.random.split(key)

    B, C, H, W = 2, 4, 16, 16
    x = jax.random.normal(k1, (B, C, H, W), dtype=jnp.float32)
    target_feature = jax.random.normal(k2, (B, C, H, W), dtype=jnp.float32)

    module = StyleLoss(target_feature)
    out = module(x)
    out = jax.block_until_ready(out)
    loss = jax.block_until_ready(module.loss)

    # Pure-JAX reference of the PyTorch module.
    def gram_ref(f):
        b, c, h, w = f.shape
        feat = f.reshape(b * c, h * w)
        return (feat @ feat.T) / (b * c * h * w)

    ref_loss = jnp.mean((gram_ref(x) - gram_ref(target_feature)) ** 2)
    assert jnp.allclose(loss, ref_loss, rtol=1e-5, atol=1e-7), (loss, ref_loss)
    assert jnp.array_equal(out, x)

    print("KERNEL_OK")
</pallas_src>

<mosaic_0001>
module attributes {stable_mosaic.version = 11 : i64} {
  func.func @_gram_kernel(%arg0: i32, %arg1: memref<8x256xf32, #tpu.memory_space<vmem>>, %arg2: memref<8x8xf32, #tpu.memory_space<vmem>>, %arg3: memref<8x8xf32, #tpu.memory_space<vmem>>) attributes {dimension_semantics = [#tpu.dimension_semantics<arbitrary>], iteration_bounds = array<i64: 1>, scalar_prefetch = 0 : i64, scratch_operands = 1 : i64, tpu.core_type = #tpu.core_type<tc>, window_params = [{transform_indices = @transform_0, window_bounds = array<i64: 8, 256>}, {pipeline_mode = #tpu.pipeline_mode<synchronous>, transform_indices = @transform_1, window_bounds = array<i64: 8, 8>}]} {
    %c0_i32 = arith.constant 0 : i32
    %0 = arith.cmpi eq, %arg0, %c0_i32 : i32
    %1 = arith.extui %0 : i1 to i32
    %c0_i32_0 = arith.constant 0 : i32
    %2 = arith.cmpi ne, %1, %c0_i32_0 : i32
    scf.if %2 {
      %cst_8 = arith.constant 0.000000e+00 : f32
      %11 = vector.broadcast %cst_8 : f32 to vector<8x8xf32>
      %c0_9 = arith.constant 0 : index
      %c0_10 = arith.constant 0 : index
      %12 = vector.load %arg3[%c0_9, %c0_10] : memref<8x8xf32, #tpu.memory_space<vmem>>, vector<8x8xf32>
      tpu.vector_store %arg3[%c0_9, %c0_10], %11 {strides = array<i32>} : memref<8x8xf32, #tpu.memory_space<vmem>>, vector<8x8xf32>,
    } else {
    }
    %c0 = arith.constant 0 : index
    %c0_1 = arith.constant 0 : index
    %3 = vector.load %arg1[%c0, %c0_1] : memref<8x256xf32, #tpu.memory_space<vmem>>, vector<8x256xf32>
    %c0_2 = arith.constant 0 : index
    %c0_3 = arith.constant 0 : index
    %4 = vector.load %arg3[%c0_2, %c0_3] : memref<8x8xf32, #tpu.memory_space<vmem>>, vector<8x8xf32>
    %cst = arith.constant dense<0.000000e+00> : vector<8x8xf32>
    %5 = tpu.matmul %3, %3, %cst {dimension_numbers = #tpu.dot_dimension_numbers<[1], [1], [0], [0], [0, 0, 1, 0], [], []>} : vector<8x256xf32>, vector<8x256xf32>, vector<8x8xf32> -> vector<8x8xf32>
    %6 = arith.addf %4, %5 : vector<8x8xf32>
    %c0_4 = arith.constant 0 : index
    %c0_5 = arith.constant 0 : index
    %7 = vector.load %arg3[%c0_4, %c0_5] : memref<8x8xf32, #tpu.memory_space<vmem>>, vector<8x8xf32>
    tpu.vector_store %arg3[%c0_4, %c0_5], %6 {strides = array<i32>} : memref<8x8xf32, #tpu.memory_space<vmem>>, vector<8x8xf32>,
    %c0_i32_6 = arith.constant 0 : i32
    %8 = arith.cmpi eq, %arg0, %c0_i32_6 : i32
    %9 = arith.extui %8 : i1 to i32
    %c0_i32_7 = arith.constant 0 : i32
    %10 = arith.cmpi ne, %9, %c0_i32_7 : i32
    scf.if %10 {
      %c0_8 = arith.constant 0 : index
      %c0_9 = arith.constant 0 : index
      %11 = vector.load %arg3[%c0_8, %c0_9] : memref<8x8xf32, #tpu.memory_space<vmem>>, vector<8x8xf32>
      %cst_10 = arith.constant 4.8828125E-4 : f32
      %12 = vector.broadcast %cst_10 : f32 to vector<8x8xf32>
      %13 = arith.mulf %11, %12 : vector<8x8xf32>
      %c0_11 = arith.constant 0 : index
      %c0_12 = arith.constant 0 : index
      %14 = vector.load %arg2[%c0_11, %c0_12] : memref<8x8xf32, #tpu.memory_space<vmem>>, vector<8x8xf32>
      tpu.vector_store %arg2[%c0_11, %c0_12], %13 {strides = array<i32>} : memref<8x8xf32, #tpu.memory_space<vmem>>, vector<8x8xf32>,
    } else {
    }
    return
  }
  func.func @transform_0(%arg0: i32) -> (i32, i32) {
    %c0_i32 = arith.constant 0 : i32
    %c0_i32_0 = arith.constant 0 : i32
    return %c0_i32, %arg0 : i32, i32
  }
  func.func @transform_1(%arg0: i32) -> (i32, i32) {
    %c0_i32 = arith.constant 0 : i32
    %c0_i32_0 = arith.constant 0 : i32
    %c0_i32_1 = arith.constant 0 : i32
    return %c0_i32, %c0_i32_0 : i32, i32
  }
}

</mosaic_0001>

<bundles_post_ra>
// kernel: tpu_custom_call.1
= control target key start
LH: loop header
LB: loop body
LE: loop exit
PB: predicated region body
PF: predicated region fallthrough
CT: control target
= control target key end

     0   :  { %6 = vsyncpa [#allocation4], 0  ;;  %s175_s0 = inlined_call_operand.hbm [shape: f32[8,256], index: 0, kind: input, shape index: {}]   ;;  %s176_s1 = inlined_call_operand.hbm [shape: f32[8,8], index: 1, kind: output, shape index: {}]  }
   0x1   :  { %7 = vsyncpa [#allocation5], 0  ;;  %s13_s8 = sshll.u32 %s175_s0, 4  ;;  %s153_s9 = smov [#allocation3]   ;;  %s14_s8 = int_to_ptr.hbm [resolvable:$true] %s13_s8 }
   0x2   :  { %s15_s10 = sshll.u32 %s153_s9, 4  ;;  %s16_s10 = int_to_ptr.vmem [resolvable:$true] %s15_s10 }
   0x3   :  { %18 = dma.hbm_to_vmem [thread:$0]  %s14_s8, 256, %s16_s10, [#allocation4]  }
   0x4   :  { %149 = dma.done.wait [#allocation4], 256  }
   0x5   :  { %150 = vsyncadd [#allocation4], 4294967040  ;;  %v29_v0 = vld [vmem:[#allocation3] sm:$0xff]  ;;  %v30_v1 = vld [vmem:[#allocation3 + $0x8] sm:$0xff]  ;;  %vm27_vm0 = vcmask 64512   ;;  %v154_v2 = vmov 0.0  }
   0x6   :  { %47 = vmatpush.xpose.msra.mxu0 %v29_v0  ;;  %67 = vmatpush.xpose.msra.mxu1 %v30_v1  ;;  %28 = vst.msk [vmem:[#allocation2] sm:$0xff] %vm27_vm0, %v154_v2  ;;  %s155_s0 = smov [#allocation6]   ;;  %s88_s14 = sshll.u32 %s176_s1, 4  ;;  %s89_s14 = int_to_ptr.hbm [resolvable:$true] %s88_s14 }
   0x7   :  { %s86_s11 = sshll.u32 %s155_s0, 4  ;;  %s87_s11 = int_to_ptr.vmem [resolvable:$true] %s86_s11 }
   0x9   :  { %48 = vmatmul.f32.vlgmr.msra.gmra.mxu0 %v29_v0  ;;  %68 = vmatmul.f32.vlgmr.msra.gmra.mxu1 %v30_v1 }
   0xd   :  { %v31_v4 = vld [vmem:[#allocation2] sm:$0xff] }
  0x86   :  { %v49_v3 = vpop.f32.mrf.mxu0  ;;  %v69_v5 = vpop.f32.mrf.mxu1 }
  0x87   :  { %v70_v6 = vadd.f32 %v69_v5, %v49_v3 }
  0x89   :  { %v72_v7 = vadd.f32 %v70_v6, %v31_v4 }
  0x8b   :  { %74 = vst.msk [vmem:[#allocation2] sm:$0xff] %vm27_vm0, %v72_v7 }
  0x92   :  { %v78_v8 = vld [vmem:[#allocation2] sm:$0xff] }
  0x93   :  { %v79_v9 = vmul.f32 0.00048828125, %v78_v8 }
  0x95   :  { %80 = vst.msk [vmem:[#allocation6] sm:$0xff] %vm27_vm0, %v79_v9 }
  0x96   :  { %91 = dma.vmem_to_hbm [thread:$0]  %s87_s11, 128, %s89_s14, [#allocation5]  }
  0x97   :  { %151 = dma.done.wait [#allocation5], 128  }
  0x98   :  { %152 = vsyncadd [#allocation5], 4294967168 }
  0x99   :  { %96 = vsyncpa [#allocation4], 1 }
  0x9a   :  { %97 = vsyncpa [#allocation5], 1 }

</bundles_post_ra>
